<compile_context>
chip_gen: v7x
topology: tpu7x:2x2x1
jax: 0.10.0
libtpu: 0.0.40
codegen_flags: <defaults>
</compile_context>

<pallas_src>
import jax
import jax.numpy as jnp
from jax.experimental import pallas as pl
from jax.experimental.pallas import tpu as pltpu


def _round_up(x, m):
    return ((x + m - 1) // m) * m


# -----------------------------------------------------------------------------
# Kernels
# -----------------------------------------------------------------------------
def _gcn_kernel_ax_first(a_ref, x_ref, w_ref, b_ref, o_ref, acc_ref):
    """out = (A @ X) @ W + b ; acc holds the running (tm, in_dim) A@X tile."""
    k = pl.program_id(1)

    @pl.when(k == 0)
    def _init():
        acc_ref[...] = jnp.zeros_like(acc_ref)

    acc_ref[...] += jnp.dot(
        a_ref[...], x_ref[...], preferred_element_type=jnp.float32
    )

    @pl.when(k == pl.num_programs(1) - 1)
    def _finalize():
        o_ref[...] = (
            jnp.dot(acc_ref[...], w_ref[...], preferred_element_type=jnp.float32)
            + b_ref[...]
        ).astype(o_ref.dtype)


def _gcn_kernel_xw_first(a_ref, x_ref, w_ref, b_ref, o_ref, acc_ref):
    """out = A @ (X @ W) + b ; acc holds the running (tm, Hp) output tile."""
    k = pl.program_id(1)

    @pl.when(k == 0)
    def _init():
        acc_ref[...] = jnp.zeros_like(acc_ref)

    xw = jnp.dot(
        x_ref[...], w_ref[...], preferred_element_type=jnp.float32
    ).astype(a_ref.dtype)
    acc_ref[...] += jnp.dot(a_ref[...], xw, preferred_element_type=jnp.float32)

    @pl.when(k == pl.num_programs(1) - 1)
    def _finalize():
        o_ref[...] = (acc_ref[...] + b_ref[...]).astype(o_ref.dtype)


# -----------------------------------------------------------------------------
# Wrapper
# -----------------------------------------------------------------------------
def gcn_forward(A, X, W, b, *, tm=256, tk=512, compute_dtype=jnp.bfloat16):
    """Fused, tiled GCN forward.

    A : (N, N)        adjacency
    X : (N, in_dim)   node features
    W : (in_dim, H)   linear weight (pre-transposed from PyTorch's (H, in_dim))
    b : (H,) or (1,H) linear bias
    returns (N, H) float32
    """
    N, d = X.shape
    H = W.shape[1]
    b = jnp.reshape(b, (1, H))

    # Lane-dense output: pad hidden dim to a multiple of 128.
    Hp = _round_up(H, 128)

    # MXU / (8,128)-aligned tiles, clamped to the padded problem size.
    tm = _round_up(max(8, min(tm, _round_up(N, 8))), 8)
    tk = _round_up(max(128, min(tk, _round_up(N, 128))), 128)
    Nr = _round_up(N, tm)   # padded row extent
    Nk = _round_up(N, tk)   # padded contraction extent

    # Choose matmul order from shapes: (A@X)@W when in_dim <= Hp, else A@(X@W).
    xw_first = d > Hp
    w_dtype = compute_dtype if xw_first else jnp.float32

    # Zero-padded, dtype-cast operands (zero padding does not change results).
    A_p = jnp.zeros((Nr, Nk), compute_dtype).at[:N, :N].set(A.astype(compute_dtype))
    X_p = jnp.zeros((Nk, d), compute_dtype).at[:N, :].set(X.astype(compute_dtype))
    W_p = jnp.zeros((d, Hp), w_dtype).at[:, :H].set(W.astype(w_dtype))
    b_p = jnp.zeros((1, Hp), jnp.float32).at[:, :H].set(b.astype(jnp.float32))

    if xw_first:
        kernel = _gcn_kernel_xw_first
        acc = pltpu.VMEM((tm, Hp), jnp.float32)
    else:
        kernel = _gcn_kernel_ax_first
        acc = pltpu.VMEM((tm, d), jnp.float32)

    grid = (Nr // tm, Nk // tk)

    out = pl.pallas_call(
        kernel,
        out_shape=jax.ShapeDtypeStruct((Nr, Hp), jnp.float32),
        grid_spec=pltpu.PrefetchScalarGridSpec(
            num_scalar_prefetch=0,
            grid=grid,
            in_specs=[
                # A tile streams over (rows, k).
                pl.BlockSpec((tm, tk), lambda i, k: (i, k)),
                # X tile streams over k only.
                pl.BlockSpec((tk, d), lambda i, k: (k, 0)),
                # W and b are resident (constant index_map -> DMA'd once).
                pl.BlockSpec((d, Hp), lambda i, k: (0, 0)),
                pl.BlockSpec((1, Hp), lambda i, k: (0, 0)),
            ],
            out_specs=pl.BlockSpec((tm, Hp), lambda i, k: (i, 0)),
            scratch_shapes=[acc],
        ),
        compiler_params=pltpu.CompilerParams(
            dimension_semantics=("parallel", "arbitrary"),
            vmem_limit_bytes=32 * 1024 * 1024,
        ),
    )(A_p, X_p, W_p, b_p)

    return out[:N, :H]


def init_params(key, input_dim, hidden_dim):
    """Deterministic init mimicking nn.Linear's uniform(-1/sqrt(in), 1/sqrt(in))."""
    kw, kb = jax.random.split(key)
    bound = 1.0 / jnp.sqrt(jnp.float32(input_dim))
    W = jax.random.uniform(
        kw, (input_dim, hidden_dim), dtype=jnp.float32, minval=-bound, maxval=bound
    )
    b = jax.random.uniform(
        kb, (1, hidden_dim), dtype=jnp.float32, minval=-bound, maxval=bound
    )
    return W, b


if __name__ == "__main__":
    key = jax.random.PRNGKey(0)
    k_a, k_x, k_p, k_a2, k_x2, k_p2 = jax.random.split(key, 6)

    # ---- module-consistent small shapes (dropout p / num_classes unused) ----
    N, input_dim, hidden_dim = 8, 16, 32
    A = jax.random.normal(k_a, (N, N), dtype=jnp.float32)
    X = jax.random.normal(k_x, (N, input_dim), dtype=jnp.float32)
    W, b = init_params(k_p, input_dim, hidden_dim)

    out = jax.block_until_ready(gcn_forward(A, X, W, b))
    assert out.shape == (N, hidden_dim)

    # Reference with matching bf16 input rounding, f32 accumulation.
    hi = jax.lax.Precision.HIGHEST
    Ab = A.astype(jnp.bfloat16).astype(jnp.float32)
    Xb = X.astype(jnp.bfloat16).astype(jnp.float32)
    ref = jnp.dot(jnp.dot(Ab, Xb, precision=hi), W, precision=hi) + b
    rel_err = jnp.linalg.norm(out - ref) / jnp.linalg.norm(ref)
    assert float(rel_err) < 1e-2, float(rel_err)

    # ---- exercise the multi-tile grid + reordered A@(X@W) path --------------
    N2, d2, h2 = 256, 256, 32
    A2 = jax.random.normal(k_a2, (N2, N2), dtype=jnp.float32)
    X2 = jax.random.normal(k_x2, (N2, d2), dtype=jnp.float32)
    W2, b2 = init_params(k_p2, d2, h2)

    out2 = jax.block_until_ready(gcn_forward(A2, X2, W2, b2, tm=128, tk=128))
    assert out2.shape == (N2, h2)

    Ab2 = A2.astype(jnp.bfloat16).astype(jnp.float32)
    Xb2 = X2.astype(jnp.bfloat16).astype(jnp.float32)
    Wb2 = W2.astype(jnp.bfloat16).astype(jnp.float32)
    XWb2 = jnp.dot(Xb2, Wb2, precision=hi).astype(jnp.bfloat16).astype(jnp.float32)
    ref2 = jnp.dot(Ab2, XWb2, precision=hi) + b2
    rel_err2 = jnp.linalg.norm(out2 - ref2) / jnp.linalg.norm(ref2)
    assert float(rel_err2) < 1e-2, float(rel_err2)

    print("KERNEL_OK")
</pallas_src>

<mosaic_0001>
module attributes {stable_mosaic.version = 11 : i64} {
  func.func @_gcn_kernel_ax_first(%arg0: i32, %arg1: i32, %arg2: memref<8x128xbf16, #tpu.memory_space<vmem>>, %arg3: memref<128x16xbf16, #tpu.memory_space<vmem>>, %arg4: memref<16x128xf32, #tpu.memory_space<vmem>>, %arg5: memref<1x128xf32, #tpu.memory_space<vmem>>, %arg6: memref<8x128xf32, #tpu.memory_space<vmem>>, %arg7: memref<8x16xf32, #tpu.memory_space<vmem>>) attributes {dimension_semantics = [#tpu.dimension_semantics<parallel>, #tpu.dimension_semantics<arbitrary>], iteration_bounds = array<i64: 1, 1>, scalar_prefetch = 0 : i64, scratch_operands = 1 : i64, tpu.core_type = #tpu.core_type<tc>, window_params = [{transform_indices = @transform_0, window_bounds = array<i64: 8, 128>}, {transform_indices = @transform_1, window_bounds = array<i64: 128, 16>}, {pipeline_mode = #tpu.pipeline_mode<synchronous>, transform_indices = @transform_2, window_bounds = array<i64: 16, 128>}, {pipeline_mode = #tpu.pipeline_mode<synchronous>, transform_indices = @transform_3, window_bounds = array<i64: 1, 128>}, {transform_indices = @transform_4, window_bounds = array<i64: 8, 128>}]} {
    %c0_i32 = arith.constant 0 : i32
    %0 = arith.cmpi eq, %arg1, %c0_i32 : i32
    %1 = arith.extui %0 : i1 to i32
    %c0_i32_0 = arith.constant 0 : i32
    %2 = arith.cmpi ne, %1, %c0_i32_0 : i32
    scf.if %2 {
      %cst_10 = arith.constant 0.000000e+00 : f32
      %12 = vector.broadcast %cst_10 : f32 to vector<8x16xf32>
      %c0_11 = arith.constant 0 : index
      %c0_12 = arith.constant 0 : index
      %13 = vector.load %arg7[%c0_11, %c0_12] : memref<8x16xf32, #tpu.memory_space<vmem>>, vector<8x16xf32>
      tpu.vector_store %arg7[%c0_11, %c0_12], %12 {strides = array<i32>} : memref<8x16xf32, #tpu.memory_space<vmem>>, vector<8x16xf32>,
    } else {
    }
    %c0 = arith.constant 0 : index
    %c0_1 = arith.constant 0 : index
    %3 = vector.load %arg7[%c0, %c0_1] : memref<8x16xf32, #tpu.memory_space<vmem>>, vector<8x16xf32>
    %c0_2 = arith.constant 0 : index
    %c0_3 = arith.constant 0 : index
    %4 = vector.load %arg2[%c0_2, %c0_3] : memref<8x128xbf16, #tpu.memory_space<vmem>>, vector<8x128xbf16>
    %c0_4 = arith.constant 0 : index
    %c0_5 = arith.constant 0 : index
    %5 = vector.load %arg3[%c0_4, %c0_5] : memref<128x16xbf16, #tpu.memory_space<vmem>>, vector<128x16xbf16>
    %cst = arith.constant dense<0.000000e+00> : vector<8x16xf32>
    %6 = tpu.matmul %4, %5, %cst {dimension_numbers = #tpu.dot_dimension_numbers<[1], [0], [0], [1], [0, 0, 1, 1], [], []>} : vector<8x128xbf16>, vector<128x16xbf16>, vector<8x16xf32> -> vector<8x16xf32>
    %7 = arith.addf %3, %6 : vector<8x16xf32>
    %c0_6 = arith.constant 0 : index
    %c0_7 = arith.constant 0 : index
    %8 = vector.load %arg7[%c0_6, %c0_7] : memref<8x16xf32, #tpu.memory_space<vmem>>, vector<8x16xf32>
    tpu.vector_store %arg7[%c0_6, %c0_7], %7 {strides = array<i32>} : memref<8x16xf32, #tpu.memory_space<vmem>>, vector<8x16xf32>,
    %c0_i32_8 = arith.constant 0 : i32
    %9 = arith.cmpi eq, %arg1, %c0_i32_8 : i32
    %10 = arith.extui %9 : i1 to i32
    %c0_i32_9 = arith.constant 0 : i32
    %11 = arith.cmpi ne, %10, %c0_i32_9 : i32
    scf.if %11 {
      %c0_10 = arith.constant 0 : index
      %c0_11 = arith.constant 0 : index
      %12 = vector.load %arg7[%c0_10, %c0_11] : memref<8x16xf32, #tpu.memory_space<vmem>>, vector<8x16xf32>
      %c0_12 = arith.constant 0 : index
      %c0_13 = arith.constant 0 : index
      %13 = vector.load %arg4[%c0_12, %c0_13] : memref<16x128xf32, #tpu.memory_space<vmem>>, vector<16x128xf32>
      %cst_14 = arith.constant dense<0.000000e+00> : vector<8x128xf32>
      %14 = tpu.matmul %12, %13, %cst_14 {dimension_numbers = #tpu.dot_dimension_numbers<[1], [0], [0], [1], [0, 0, 1, 1], [], []>} : vector<8x16xf32>, vector<16x128xf32>, vector<8x128xf32> -> vector<8x128xf32>
      %c0_15 = arith.constant 0 : index
      %c0_16 = arith.constant 0 : index
      %15 = vector.load %arg5[%c0_15, %c0_16] : memref<1x128xf32, #tpu.memory_space<vmem>>, vector<1x128xf32>
      %16 = vector.broadcast %15 : vector<1x128xf32> to vector<8x128xf32>
      %17 = arith.addf %14, %16 : vector<8x128xf32>
      %c0_17 = arith.constant 0 : index
      %c0_18 = arith.constant 0 : index
      %18 = vector.load %arg6[%c0_17, %c0_18] : memref<8x128xf32, #tpu.memory_space<vmem>>, vector<8x128xf32>
      tpu.vector_store %arg6[%c0_17, %c0_18], %17 {strides = array<i32>} : memref<8x128xf32, #tpu.memory_space<vmem>>, vector<8x128xf32>,
    } else {
    }
    return
  }
  func.func @transform_0(%arg0: i32, %arg1: i32) -> (i32, i32) {
    %c0_i32 = arith.constant 0 : i32
    return %arg0, %arg1 : i32, i32
  }
  func.func @transform_1(%arg0: i32, %arg1: i32) -> (i32, i32) {
    %c0_i32 = arith.constant 0 : i32
    %c0_i32_0 = arith.constant 0 : i32
    return %arg1, %c0_i32 : i32, i32
  }
  func.func @transform_2(%arg0: i32, %arg1: i32) -> (i32, i32) {
    %c0_i32 = arith.constant 0 : i32
    %c0_i32_0 = arith.constant 0 : i32
    %c0_i32_1 = arith.constant 0 : i32
    return %c0_i32, %c0_i32_0 : i32, i32
  }
  func.func @transform_3(%arg0: i32, %arg1: i32) -> (i32, i32) {
    %c0_i32 = arith.constant 0 : i32
    %c0_i32_0 = arith.constant 0 : i32
    %c0_i32_1 = arith.constant 0 : i32
    return %c0_i32, %c0_i32_0 : i32, i32
  }
  func.func @transform_4(%arg0: i32, %arg1: i32) -> (i32, i32) {
    %c0_i32 = arith.constant 0 : i32
    %c0_i32_0 = arith.constant 0 : i32
    return %arg0, %c0_i32 : i32, i32
  }
}

</mosaic_0001>

<bundles_post_ra>
// kernel: tpu_custom_call.1
= control target key start
LH: loop header
LB: loop body
LE: loop exit
PB: predicated region body
PF: predicated region fallthrough
CT: control target
= control target key end

     0   :  { %v323_v1 = vmov 0.0   ;;  %vm324_vm0 = vmmov 0   ;;  %vm23_vm1 = vcmask 130048   ;;  %s403_s0 = inlined_call_operand.vmem [shape: bf16[8,128], index: 0, kind: input, shape index: {}]   ;;  %s404_s1 = inlined_call_operand.vmem [shape: bf16[128,16], index: 1, kind: input, shape index: {}]   ;;  %s405_s2 = inlined_call_operand.vmem [shape: f32[16,128], index: 2, kind: input, shape index: {}]   ;;  %s406_s3 = inlined_call_operand.vmem [shape: f32[1,128], index: 3, kind: input, shape index: {}]   ;;  %s407_s4 = inlined_call_operand.hbm [shape: f32[8,128], index: 4, kind: output, shape index: {}]  }
   0x1   :  { %v291_v0 = vld [vmem:[%s404_s1] sm:$0xff]   ;;  %257 = vmatprep.subr.bf16.mxu0 %v323_v1  ;;  %v292_v2 = vld [vmem:[%s404_s1 + $0x8] sm:$0xff]   ;;  %273 = vmatprep.mubr.msk.bf16.mxu0 %vm324_vm0, %v323_v1  ;;  %24 = vst.msk [vmem:[#allocation2] sm:$0xff] %vm23_vm1, %v323_v1  ;;  %v293_v3 = vld [vmem:[%s404_s1 + $0x10] sm:$0xff]  }
   0x2   :  { %258 = vmatpush3.bf16.msra.mxu0 %v291_v0  ;;  %281 = vmatprep.mubr.msk.f32.mxu1 %vm324_vm0, %v323_v1 }
   0x3   :  { %259 = vmatprep.subr.bf16.mxu0 %v323_v1 }
   0x6   :  { %260 = vmatpush3.bf16.msra.mxu0 %v292_v2 }
   0x7   :  { %261 = vmatprep.subr.bf16.mxu0 %v323_v1 }
   0x8   :  { %9 = vsyncpa [#allocation4], 0  ;;  %v294_v4 = vld [vmem:[%s404_s1 + $0x18] sm:$0xff]   ;;  %v295_v5 = vld [vmem:[%s404_s1 + $0x20] sm:$0xff]   ;;  %v325_v12 = vmov 0.0|0.0  }
   0x9   :  { %v296_v6 = vld [vmem:[%s404_s1 + $0x28] sm:$0xff]   ;;  %v297_v7 = vld [vmem:[%s404_s1 + $0x30] sm:$0xff]   ;;  %v298_v8 = vld [vmem:[%s404_s1 + $0x38] sm:$0xff]   ;;  %284 = vmatprep.subr.bf16.mxu1 %v325_v12 }
   0xa   :  { %262 = vmatpush3.bf16.msra.mxu0 %v293_v3  ;;  %v26_v9 = vld [vmem:[%s403_s0] sm:$0xf]  ;;  %v139_v11 = vld [vmem:[%s405_s2 + $0x8] sm:$0xff] }
   0xb   :  { %263 = vmatprep.subr.bf16.mxu0 %v323_v1  ;;  %v138_v10 = vld [vmem:[%s405_s2] sm:$0xff]  ;;  %s326_s2 = smov [#allocation3]  }
   0xc   :  { %v285_v13 = vpack.c.bf16 %v139_v11, %v138_v10  ;;  %v25_v14 = vld [vmem:[#allocation2] sm:$0xff]  ;;  %s227_s11 = sshll.u32 %s326_s2, 4  ;;  %s228_s11 = int_to_ptr.vmem [resolvable:$true] %s227_s11 }
   0xd   :  { %v243_v21 = vld [vmem:[%s406_s3] ss:$0 sm:$0xff]  ;;  %s299_s12 = scalar_lea.vmem %s228_s11, 128  ;;  %p304_p1 = scmp.lt.s32.totalorder %s228_s11, %s228_s11 }
   0xe   :  { %264 = vmatpush3.bf16.msra.mxu0 %v294_v4  ;;  %286 = vmatpush3.bf16.msra.mxu1 %v285_v13  ;;  %p300_p0 = scmp.ne.s32.totalorder %s228_s11, %s299_s12  ;;  %p305_p2 = scmp.lt.s32.totalorder %s299_s12, %s299_s12 }
   0xf   :  { %265 = vmatprep.subr.bf16.mxu0 %v323_v1 }
  0x10   :  { %p306_p3 = por %p305_p2, %p304_p1 }
  0x12   :  { %266 = vmatpush3.bf16.msra.mxu0 %v295_v5  ;;  %p307_p4 = pnand %p306_p3, %p300_p0 }
  0x13   :  { %267 = vmatprep.subr.bf16.mxu0 %v323_v1 }
  0x16   :  { %268 = vmatpush3.bf16.msra.mxu0 %v296_v6 }
  0x17   :  { %269 = vmatprep.subr.bf16.mxu0 %v323_v1 }
  0x1a   :  { %270 = vmatpush3.bf16.msra.mxu0 %v297_v7 }
  0x1b   :  { %271 = vmatprep.subr.bf16.mxu0 %v323_v1 }
  0x1e   :  { %272 = vmatpush3.bf16.msra.mxu0 %v298_v8 }
  0x21   :  { %274 = vmatmul.mubr.bf16.vlgmr.msra.gmra.mrb[0].mxu0 %v26_v9 }
  0xf4   :  { %v125_v15 = vpop.f32.mrb[0].mxu0 }
  0xf5   :  { %v131_v16 = vadd.f32 %v125_v15, %v25_v14  ;;  %v275_v17 = vpop.f32.mrb[1].mxu0 }
  0xf6   :  { %v128_v18 = vpop.f32.mrb[2].mxu0 }
  0xf7   :  { %133 = vst.msk [vmem:[#allocation2] sm:$0xff] %vm23_vm1, %v131_v16  ;;  %v276_v19 = vpop.f32.mrb[3].mxu0 }
  0xfe   :  { %v137_v20 = vld [vmem:[#allocation2] sm:$0xff] }
  0xff   :  { %282 = vmatmul.mubr.msk.f32.vlgmr.msra.gmra.mrb[0].mxu1 %vm23_vm1, %v137_v20 }
 0x1d2   :  { %v216_v22 = vpop.f32.mrb[0].mxu1 }
 0x1d3   :  { %v217_v23 = vadd.f32 %v243_v21, %v216_v22  ;;  %v283_v24 = vpop.f32.mrb[1].mxu1 }
 0x1d5   :  { %220 = vst [vmem:[#allocation3] sm:$0xff] %v217_v23 }
 0x1d6   :  { %310 = shalt.err (!%p307_p4)
}
 0x1d7   :  { %s311_s15 = scalar_lea.hbm %s407_s4, 128 }
 0x1d8   :  { %p312_p5 = scmp.ne.s32.totalorder %s407_s4, %s311_s15  ;;  %p315_p6 = scmp.lt.u32.totalorder %s311_s15, %s407_s4 }
 0x1da   :  { %p317_p7 = pnand %p315_p6, %p312_p5 }
 0x1dc   :  { %320 = shalt.err (!%p317_p7)
}
 0x1dd   :  { %230 = dma.vmem_to_hbm [thread:$0]  %s228_s11, 128, %s407_s4, [#allocation4]  }
 0x1de   :  { %321 = dma.done.wait [#allocation4], 128  }
 0x1df   :  { %322 = vsyncadd [#allocation4], 4294967168 }
 0x1e0   :  { %234 = vsyncpa [#allocation4], 1 }

</bundles_post_ra>
